<compile_context>
chip_gen: v7x
topology: tpu7x:2x2x1
jax: 0.10.0
libtpu: 0.0.40
codegen_flags: <defaults>
</compile_context>

<pallas_src>
import functools

import jax
import jax.numpy as jnp
from jax.experimental import pallas as pl
from jax.experimental.pallas import tpu as pltpu

FMNIST_INPUT_SIZE = 784
HIDDEN_LAYER_SIZE_1 = 512
HIDDEN_LAYER_SIZE_2 = 256
OUT_PAD = 128  # fc3 output lanes padded to one full vreg lane width


def _encoder_kernel(x_ref, w1_ref, b1_ref, w2_ref, b2_ref, w3_ref, b3_ref, o_ref):
    # In-kernel f32 -> bf16 cast of the activations (feedback #1): x arrives as
    # raw f32, the MXU consumes bf16, accumulation stays f32.
    x = x_ref[...].astype(jnp.bfloat16)
    # fc1 + ReLU
    h1 = jnp.dot(x, w1_ref[...], preferred_element_type=jnp.float32)
    h1 = jnp.maximum(h1 + b1_ref[...], 0.0).astype(jnp.bfloat16)
    # fc2 + ReLU
    h2 = jnp.dot(h1, w2_ref[...], preferred_element_type=jnp.float32)
    h2 = jnp.maximum(h2 + b2_ref[...], 0.0).astype(jnp.bfloat16)
    # fc3 (no activation); bf16 writeback, 128 lanes wide (unmasked stores).
    o_ref[...] = (jnp.dot(h2, w3_ref[...], preferred_element_type=jnp.float32)
                  + b3_ref[...]).astype(o_ref.dtype)


def prepare_params(params):
    """One-time conversion of raw f32 [in,out] params to kernel-ready form.

    Hoists the fc3 lane padding and the bf16 weight cast out of the per-call
    path.  Biases stay f32 (tiny; added to the f32 accumulator).
    """
    w1, b1, w2, b2, w3, b3 = params
    out_dim = w3.shape[1]  # 2 * dim_encoding
    w3_p = jnp.zeros((HIDDEN_LAYER_SIZE_2, OUT_PAD), jnp.float32).at[:, :out_dim].set(w3)
    b3_p = jnp.zeros((OUT_PAD,), jnp.float32).at[:out_dim].set(b3)
    return dict(
        w1=w1.astype(jnp.bfloat16),
        b1=b1.reshape(1, -1).astype(jnp.float32),
        w2=w2.astype(jnp.bfloat16),
        b2=b2.reshape(1, -1).astype(jnp.float32),
        w3=w3_p.astype(jnp.bfloat16),
        b3=b3_p.reshape(1, -1).astype(jnp.float32),
        out_dim=out_dim,
    )


def _round_up(v, m):
    return ((v + m - 1) // m) * m


@functools.partial(jax.jit, static_argnames=("out_dim",))
def _encoder_call(x_flat_f32, w1, b1, w2, b2, w3, b3, *, out_dim):
    B = x_flat_f32.shape[0]
    # Batch tile: big enough to amortize per-grid-step overhead (<=1024 rows),
    # but capped at ceil(B/2) so large batches always yield >=2 (evenly split)
    # grid steps for v7x dual-TensorCore sharding; small B rounds up to a
    # sublane multiple of 8 and runs as one tile.
    TB = min(1024, _round_up(pl.cdiv(B, 2), 8))
    B_pad = _round_up(B, TB)
    if B_pad != B:
        x_flat_f32 = jnp.pad(x_flat_f32, ((0, B_pad - B), (0, 0)))

    resident = lambda shape: pl.BlockSpec(shape, lambda i: (0, 0))

    out = pl.pallas_call(
        _encoder_kernel,
        out_shape=jax.ShapeDtypeStruct((B_pad, OUT_PAD), jnp.bfloat16),
        grid=(B_pad // TB,),
        in_specs=[
            pl.BlockSpec((TB, FMNIST_INPUT_SIZE), lambda i: (i, 0)),   # x (f32)
            resident((FMNIST_INPUT_SIZE, HIDDEN_LAYER_SIZE_1)),        # w1 (bf16)
            resident((1, HIDDEN_LAYER_SIZE_1)),                        # b1 (f32)
            resident((HIDDEN_LAYER_SIZE_1, HIDDEN_LAYER_SIZE_2)),      # w2 (bf16)
            resident((1, HIDDEN_LAYER_SIZE_2)),                        # b2 (f32)
            resident((HIDDEN_LAYER_SIZE_2, OUT_PAD)),                  # w3 (bf16, padded)
            resident((1, OUT_PAD)),                                    # b3 (f32, padded)
        ],
        out_specs=pl.BlockSpec((TB, OUT_PAD), lambda i: (i, 0)),
        compiler_params=pltpu.CompilerParams(
            dimension_semantics=("parallel",),
            vmem_limit_bytes=32 << 20,
        ),
    )(x_flat_f32, w1, b1, w2, b2, w3, b3)

    # bf16 padded block -> exact [B, 2*dim_encoding] f32 (tiny; fuses under jit).
    return out[:B, :out_dim].astype(jnp.float32)


def vae_encoder_forward(x, prep):
    """x: [B, 1, 28, 28] float32 (NCHW). Returns [B, 2 * dim_encoding] float32."""
    B = x.shape[0]
    # torch.flatten(x, start_dim=1); stays f32 -- the bf16 cast is in-kernel.
    x_flat = x.reshape(B, -1)
    assert x_flat.shape[1] == FMNIST_INPUT_SIZE
    return _encoder_call(
        x_flat, prep["w1"], prep["b1"], prep["w2"], prep["b2"],
        prep["w3"], prep["b3"], out_dim=prep["out_dim"])


def init_params(key, dim_encoding):
    """Deterministic init mimicking nn.Linear default (U[-1/sqrt(fan_in), +])."""
    def linear(k, fan_in, fan_out):
        kw, kb = jax.random.split(k)
        bound = 1.0 / jnp.sqrt(fan_in)
        w = jax.random.uniform(kw, (fan_in, fan_out), jnp.float32, -bound, bound)
        b = jax.random.uniform(kb, (fan_out,), jnp.float32, -bound, bound)
        return w, b

    k1, k2, k3 = jax.random.split(key, 3)
    w1, b1 = linear(k1, FMNIST_INPUT_SIZE, HIDDEN_LAYER_SIZE_1)
    w2, b2 = linear(k2, HIDDEN_LAYER_SIZE_1, HIDDEN_LAYER_SIZE_2)
    w3, b3 = linear(k3, HIDDEN_LAYER_SIZE_2, dim_encoding * 2)
    return (w1, b1, w2, b2, w3, b3)


def _reference_forward(x, prep):
    """Pure-JAX reference using the same bf16-weight / f32-accumulate numerics."""
    h = x.reshape(x.shape[0], -1).astype(jnp.bfloat16)
    h = jnp.maximum(
        jnp.dot(h, prep["w1"], preferred_element_type=jnp.float32) + prep["b1"], 0.0)
    h = jnp.maximum(
        jnp.dot(h.astype(jnp.bfloat16), prep["w2"],
                preferred_element_type=jnp.float32) + prep["b2"], 0.0)
    out = (jnp.dot(h.astype(jnp.bfloat16), prep["w3"],
                   preferred_element_type=jnp.float32) + prep["b3"])
    # Mirror the kernel's bf16 writeback.
    out = out.astype(jnp.bfloat16).astype(jnp.float32)
    return out[:, :prep["out_dim"]]


if __name__ == "__main__":
    dim_encoding = 2
    batch = 6  # matches the docstring example: x [6,1,28,28] -> out [6, 4]

    key = jax.random.PRNGKey(0)
    kx, kp = jax.random.split(key)
    x = jax.random.normal(kx, (batch, 1, 28, 28), jnp.float32)
    params = init_params(kp, dim_encoding)
    prep = prepare_params(params)

    out = jax.block_until_ready(vae_encoder_forward(x, prep))
    ref = _reference_forward(x, prep)
    assert out.shape == (batch, dim_encoding * 2), out.shape
    assert jnp.allclose(out, ref, atol=2e-2, rtol=2e-2), "mismatch vs reference (small B)"

    # Multi-tile path: 300 rows -> TB=152, 2 even grid steps (v7x dual-TC friendly).
    kx2, _ = jax.random.split(kx)
    x_big = jax.random.normal(kx2, (300, 1, 28, 28), jnp.float32)
    out_big = jax.block_until_ready(vae_encoder_forward(x_big, prep))
    ref_big = _reference_forward(x_big, prep)
    assert out_big.shape == (300, dim_encoding * 2), out_big.shape
    assert jnp.allclose(out_big, ref_big, atol=2e-2, rtol=2e-2), "mismatch vs reference (large B)"

    print("KERNEL_OK")
</pallas_src>

<mosaic_0001>
module attributes {stable_mosaic.version = 11 : i64} {
  func.func @_encoder_kernel(%arg0: i32, %arg1: memref<8x784xf32, #tpu.memory_space<vmem>>, %arg2: memref<784x512xbf16, #tpu.memory_space<vmem>>, %arg3: memref<1x512xf32, #tpu.memory_space<vmem>>, %arg4: memref<512x256xbf16, #tpu.memory_space<vmem>>, %arg5: memref<1x256xf32, #tpu.memory_space<vmem>>, %arg6: memref<256x128xbf16, #tpu.memory_space<vmem>>, %arg7: memref<1x128xf32, #tpu.memory_space<vmem>>, %arg8: memref<8x128xbf16, #tpu.memory_space<vmem>>) attributes {dimension_semantics = [#tpu.dimension_semantics<parallel>], iteration_bounds = array<i64: 1>, scalar_prefetch = 0 : i64, scratch_operands = 0 : i64, tpu.core_type = #tpu.core_type<tc>, window_params = [{transform_indices = @transform_0, window_bounds = array<i64: 8, 784>}, {pipeline_mode = #tpu.pipeline_mode<synchronous>, transform_indices = @transform_1, window_bounds = array<i64: 784, 512>}, {pipeline_mode = #tpu.pipeline_mode<synchronous>, transform_indices = @transform_2, window_bounds = array<i64: 1, 512>}, {pipeline_mode = #tpu.pipeline_mode<synchronous>, transform_indices = @transform_3, window_bounds = array<i64: 512, 256>}, {pipeline_mode = #tpu.pipeline_mode<synchronous>, transform_indices = @transform_4, window_bounds = array<i64: 1, 256>}, {pipeline_mode = #tpu.pipeline_mode<synchronous>, transform_indices = @transform_5, window_bounds = array<i64: 256, 128>}, {pipeline_mode = #tpu.pipeline_mode<synchronous>, transform_indices = @transform_6, window_bounds = array<i64: 1, 128>}, {transform_indices = @transform_7, window_bounds = array<i64: 8, 128>}]} {
    %c0 = arith.constant 0 : index
    %c0_0 = arith.constant 0 : index
    %0 = vector.load %arg1[%c0, %c0_0] : memref<8x784xf32, #tpu.memory_space<vmem>>, vector<8x784xf32>
    %1 = arith.truncf %0 : vector<8x784xf32> to vector<8x784xbf16>
    %c0_1 = arith.constant 0 : index
    %c0_2 = arith.constant 0 : index
    %2 = vector.load %arg2[%c0_1, %c0_2] : memref<784x512xbf16, #tpu.memory_space<vmem>>, vector<784x512xbf16>
    %cst = arith.constant dense<0.000000e+00> : vector<8x512xf32>
    %3 = tpu.matmul %1, %2, %cst {dimension_numbers = #tpu.dot_dimension_numbers<[1], [0], [0], [1], [0, 0, 1, 1], [], []>} : vector<8x784xbf16>, vector<784x512xbf16>, vector<8x512xf32> -> vector<8x512xf32>
    %c0_3 = arith.constant 0 : index
    %c0_4 = arith.constant 0 : index
    %4 = vector.load %arg3[%c0_3, %c0_4] : memref<1x512xf32, #tpu.memory_space<vmem>>, vector<1x512xf32>
    %5 = vector.broadcast %4 : vector<1x512xf32> to vector<8x512xf32>
    %6 = arith.addf %3, %5 : vector<8x512xf32>
    %cst_5 = arith.constant 0.000000e+00 : f32
    %7 = vector.broadcast %cst_5 : f32 to vector<8x512xf32>
    %8 = arith.maximumf %6, %7 : vector<8x512xf32>
    %9 = arith.truncf %8 : vector<8x512xf32> to vector<8x512xbf16>
    %c0_6 = arith.constant 0 : index
    %c0_7 = arith.constant 0 : index
    %10 = vector.load %arg4[%c0_6, %c0_7] : memref<512x256xbf16, #tpu.memory_space<vmem>>, vector<512x256xbf16>
    %cst_8 = arith.constant dense<0.000000e+00> : vector<8x256xf32>
    %11 = tpu.matmul %9, %10, %cst_8 {dimension_numbers = #tpu.dot_dimension_numbers<[1], [0], [0], [1], [0, 0, 1, 1], [], []>} : vector<8x512xbf16>, vector<512x256xbf16>, vector<8x256xf32> -> vector<8x256xf32>
    %c0_9 = arith.constant 0 : index
    %c0_10 = arith.constant 0 : index
    %12 = vector.load %arg5[%c0_9, %c0_10] : memref<1x256xf32, #tpu.memory_space<vmem>>, vector<1x256xf32>
    %13 = vector.broadcast %12 : vector<1x256xf32> to vector<8x256xf32>
    %14 = arith.addf %11, %13 : vector<8x256xf32>
    %cst_11 = arith.constant 0.000000e+00 : f32
    %15 = vector.broadcast %cst_11 : f32 to vector<8x256xf32>
    %16 = arith.maximumf %14, %15 : vector<8x256xf32>
    %17 = arith.truncf %16 : vector<8x256xf32> to vector<8x256xbf16>
    %c0_12 = arith.constant 0 : index
    %c0_13 = arith.constant 0 : index
    %18 = vector.load %arg6[%c0_12, %c0_13] : memref<256x128xbf16, #tpu.memory_space<vmem>>, vector<256x128xbf16>
    %cst_14 = arith.constant dense<0.000000e+00> : vector<8x128xf32>
    %19 = tpu.matmul %17, %18, %cst_14 {dimension_numbers = #tpu.dot_dimension_numbers<[1], [0], [0], [1], [0, 0, 1, 1], [], []>} : vector<8x256xbf16>, vector<256x128xbf16>, vector<8x128xf32> -> vector<8x128xf32>
    %c0_15 = arith.constant 0 : index
    %c0_16 = arith.constant 0 : index
    %20 = vector.load %arg7[%c0_15, %c0_16] : memref<1x128xf32, #tpu.memory_space<vmem>>, vector<1x128xf32>
    %21 = vector.broadcast %20 : vector<1x128xf32> to vector<8x128xf32>
    %22 = arith.addf %19, %21 : vector<8x128xf32>
    %23 = arith.truncf %22 : vector<8x128xf32> to vector<8x128xbf16>
    %c0_17 = arith.constant 0 : index
    %c0_18 = arith.constant 0 : index
    %24 = vector.load %arg8[%c0_17, %c0_18] : memref<8x128xbf16, #tpu.memory_space<vmem>>, vector<8x128xbf16>
    tpu.vector_store %arg8[%c0_17, %c0_18], %23 {strides = array<i32>} : memref<8x128xbf16, #tpu.memory_space<vmem>>, vector<8x128xbf16>,
    return
  }
  func.func @transform_0(%arg0: i32) -> (i32, i32) {
    %c0_i32 = arith.constant 0 : i32
    %c0_i32_0 = arith.constant 0 : i32
    return %arg0, %c0_i32 : i32, i32
  }
  func.func @transform_1(%arg0: i32) -> (i32, i32) {
    %c0_i32 = arith.constant 0 : i32
    %c0_i32_0 = arith.constant 0 : i32
    %c0_i32_1 = arith.constant 0 : i32
    return %c0_i32, %c0_i32_0 : i32, i32
  }
  func.func @transform_2(%arg0: i32) -> (i32, i32) {
    %c0_i32 = arith.constant 0 : i32
    %c0_i32_0 = arith.constant 0 : i32
    %c0_i32_1 = arith.constant 0 : i32
    return %c0_i32, %c0_i32_0 : i32, i32
  }
  func.func @transform_3(%arg0: i32) -> (i32, i32) {
    %c0_i32 = arith.constant 0 : i32
    %c0_i32_0 = arith.constant 0 : i32
    %c0_i32_1 = arith.constant 0 : i32
    return %c0_i32, %c0_i32_0 : i32, i32
  }
  func.func @transform_4(%arg0: i32) -> (i32, i32) {
    %c0_i32 = arith.constant 0 : i32
    %c0_i32_0 = arith.constant 0 : i32
    %c0_i32_1 = arith.constant 0 : i32
    return %c0_i32, %c0_i32_0 : i32, i32
  }
  func.func @transform_5(%arg0: i32) -> (i32, i32) {
    %c0_i32 = arith.constant 0 : i32
    %c0_i32_0 = arith.constant 0 : i32
    %c0_i32_1 = arith.constant 0 : i32
    return %c0_i32, %c0_i32_0 : i32, i32
  }
  func.func @transform_6(%arg0: i32) -> (i32, i32) {
    %c0_i32 = arith.constant 0 : i32
    %c0_i32_0 = arith.constant 0 : i32
    %c0_i32_1 = arith.constant 0 : i32
    return %c0_i32, %c0_i32_0 : i32, i32
  }
  func.func @transform_7(%arg0: i32) -> (i32, i32) {
    %c0_i32 = arith.constant 0 : i32
    %c0_i32_0 = arith.constant 0 : i32
    return %arg0, %c0_i32 : i32, i32
  }
}

</mosaic_0001>

<bundles_post_ra>
// kernel: _encoder_call.1
= control target key start
LH: loop header
LB: loop body
LE: loop exit
PB: predicated region body
PF: predicated region fallthrough
CT: control target
= control target key end

     0   :  { %12 = vsyncpa [#allocation3], 0  ;;  %s3317_s0 = inlined_call_operand.vmem [shape: f32[8,784], index: 0, kind: input, shape index: {}]   ;;  %s3318_s1 = inlined_call_operand.hbm [shape: bf16[784,512], index: 1, kind: input, shape index: {}]   ;;  %s3319_s2 = inlined_call_operand.hbm [shape: f32[1,512], index: 2, kind: input, shape index: {}]   ;;  %s3320_s3 = inlined_call_operand.hbm [shape: bf16[512,256], index: 3, kind: input, shape index: {}]   ;;  %s3321_s4 = inlined_call_operand.vmem [shape: f32[1,256], index: 4, kind: input, shape index: {}]   ;;  %s3322_s5 = inlined_call_operand.vmem [shape: bf16[256,128], index: 5, kind: input, shape index: {}]   ;;  %s3323_s6 = inlined_call_operand.vmem [shape: f32[1,128], index: 6, kind: input, shape index: {}]   ;;  %s3324_s7 = inlined_call_operand.vmem [shape: bf16[8,128], index: 7, kind: output, shape index: {}]  }
   0x1   :  { %13 = vsyncpa [#allocation5], 0  ;;  %s3098_s24 = smov [#allocation4]   ;;  %s3099_s26 = smov [#allocation2]  }
   0x2   :  { %s34_s25 = sshll.u32 %s3098_s24, 4  ;;  %s21_s27 = sshll.u32 %s3099_s26, 4  ;;  %s35_s25 = int_to_ptr.vmem [resolvable:$true] %s34_s25  ;;  %s3146_s27 = int_to_ptr.vmem [resolvable:$true] %s21_s27 }
   0x3   :  { %s3028_s30 = scalar_lea.hbm %s3319_s2, 64 }
   0x4   :  { %p3029_p0 = scmp.ne.s32.totalorder %s3319_s2, %s3028_s30  ;;  %p3032_p1 = scmp.lt.u32.totalorder %s3028_s30, %s3319_s2 }
   0x6   :  { %p3034_p2 = pnand %p3032_p1, %p3029_p0 }
   0x8   :  { %3037 = shalt.err (!%p3034_p2)
}
   0x9   :  { %s3038_s12 = scalar_lea.vmem %s35_s25, 64  ;;  %p3043_p4 = scmp.lt.s32.totalorder %s35_s25, %s35_s25 }
   0xa   :  { %p3039_p3 = scmp.ne.s32.totalorder %s35_s25, %s3038_s12  ;;  %p3044_p5 = scmp.lt.s32.totalorder %s3038_s12, %s3038_s12 }
   0xc   :  { %p3045_p6 = por %p3044_p5, %p3043_p4 }
   0xe   :  { %p3046_p7 = pnand %p3045_p6, %p3039_p3 }
  0x10   :  { %3049 = shalt.err (!%p3046_p7)
}
  0x11   :  { %37 = dma.hbm_to_vmem [thread:$0]  %s3319_s2, 64, %s35_s25, [#allocation5]  }
  0x12   :  { %s3050_s17 = scalar_lea.hbm %s3318_s1, 25088 }
  0x13   :  { %p3051_p8 = scmp.ne.s32.totalorder %s3318_s1, %s3050_s17  ;;  %p3054_p9 = scmp.lt.u32.totalorder %s3050_s17, %s3318_s1 }
  0x15   :  { %p3056_p10 = pnand %p3054_p9, %p3051_p8 }
  0x17   :  { %3059 = shalt.err (!%p3056_p10)
}
  0x18   :  { %s3060_s22 = scalar_lea.vmem %s3146_s27, 25088  ;;  %p3065_p12 = scmp.lt.s32.totalorder %s3146_s27, %s3146_s27 }
  0x19   :  { %p3061_p11 = scmp.ne.s32.totalorder %s3146_s27, %s3060_s22  ;;  %p3066_p13 = scmp.lt.s32.totalorder %s3060_s22, %s3060_s22 }
  0x1b   :  { %p3067_p0 = por %p3066_p13, %p3065_p12 }
  0x1d   :  { %p3068_p1 = pnand %p3067_p0, %p3061_p11 }
  0x1f   :  { %3071 = shalt.err (!%p3068_p1)
}
  0x20   :  { %s3100_s2 = smov 256   ;;  %s3101_s23 = smov 16  }
  0x21   :  { %27 = dma.hbm_to_vmem [thread:$0]  %s3318_s1, 25088, %s3146_s27, [#allocation3], %s3100_s2, %s3100_s2, %s3101_s23  }
  0x22   :  { %s3102_s26 = smov [#allocation6]   ;;  %s3072_s8 = scalar_lea.hbm %s3320_s3, 8192 }
  0x23   :  { %s43_s28 = sshll.u32 %s3102_s26, 4  ;;  %p3073_p2 = scmp.ne.s32.totalorder %s3320_s3, %s3072_s8  ;;  %s44_s28 = int_to_ptr.vmem [resolvable:$true] %s43_s28 }
  0x24   :  { %p3076_p3 = scmp.lt.u32.totalorder %s3072_s8, %s3320_s3 }
  0x26   :  { %p3078_p4 = pnand %p3076_p3, %p3073_p2 }
  0x28   :  { %3081 = shalt.err (!%p3078_p4)
}
  0x29   :  { %s3082_s13 = scalar_lea.vmem %s44_s28, 8192  ;;  %p3087_p6 = scmp.lt.s32.totalorder %s44_s28, %s44_s28 }
  0x2a   :  { %p3083_p5 = scmp.ne.s32.totalorder %s44_s28, %s3082_s13  ;;  %p3088_p7 = scmp.lt.s32.totalorder %s3082_s13, %s3082_s13 }
  0x2c   :  { %p3089_p8 = por %p3088_p7, %p3087_p6 }
  0x2e   :  { %p3090_p9 = pnand %p3089_p8, %p3083_p5 }
  0x30   :  { %3093 = shalt.err (!%p3090_p9)
}
  0x31   :  { %s3103_s1 = smov 128   ;;  %s3104_s27 = smov 8  }
  0x32   :  { %49 = dma.hbm_to_vmem [thread:$0]  %s3320_s3, 8192, %s44_s28, [#allocation5], %s3103_s1, %s3103_s1, %s3104_s27  }
  0x33   :  { %3094 = dma.done.wait [#allocation3], 25088  }
  0x34   :  { %3095 = vsyncadd [#allocation3], 4294942208 }
  0x35   :  { %3096 = dma.done.wait [#allocation5], 8256  }
  0x36   :  { %3097 = vsyncadd [#allocation5], 4294959040  ;;  %v2622_v0 = vld [vmem:[#allocation2 + $0x4] ss:$16 sps:$4 sm:$0xff]   ;;  %v2626_v2 = vld [vmem:[#allocation2] ss:$16 sps:$4 sm:$0xff]  }
  0x37   :  { %v2624_v1 = vld [vmem:[#allocation2 + $0x204] ss:$16 sps:$4 sm:$0xff]   ;;  %1282 = vmatprep.subr.bf16.mxu1 %v2622_v0  ;;  %v2627_v3 = vld [vmem:[#allocation2 + $0x200] ss:$16 sps:$4 sm:$0xff]   ;;  %v67_v46 = vld [vmem:[%s3317_s0 + $0x8] sm:$0xff]  ;;  %vm1278_vm0 = vcmask 130048  }
  0x38   :  { %1323 = vmatprep.subr.bf16.mxu0 %v2624_v1  ;;  %v2628_v4 = vld [vmem:[#allocation2 + $0x24] ss:$16 sps:$4 sm:$0xff]   ;;  %1283 = vmatpush1.bf16.msra.mxu1 %v2626_v2  ;;  %v2632_v6 = vld [vmem:[#allocation2 + $0x20] ss:$16 sps:$4 sm:$0xff]   ;;  %v3192_v48 = vpack.c.bf16 %v67_v46, %v67_v46  ;;  %v69_v49 = vld [vmem:[%s3317_s0 + $0x18] sm:$0xff] }
  0x39   :  { %1324 = vmatpush1.bf16.msra.mxu0 %v2627_v3  ;;  %v2630_v5 = vld [vmem:[#allocation2 + $0x224] ss:$16 sps:$4 sm:$0xff]   ;;  %1284 = vmatprep.subr.bf16.mxu1 %v2628_v4  ;;  %v2633_v7 = vld [vmem:[#allocation2 + $0x220] ss:$16 sps:$4 sm:$0xff]   ;;  %v3197_v52 = vpack.c.bf16 %v69_v49, %v69_v49  ;;  %v2775_v49 = vld [vmem:[#allocation2 + $0x128] ss:$16 sps:$4 sm:$0xff]  }
  0x3a   :  { %1325 = vmatprep.subr.bf16.mxu0 %v2630_v5  ;;  %v2634_v8 = vld [vmem:[#allocation2 + $0x44] ss:$16 sps:$4 sm:$0xff]   ;;  %v2638_v10 = vld [vmem:[#allocation2 + $0x40] ss:$16 sps:$4 sm:$0xff]   ;;  %1314 = vmatprep.mubr.bf16.mxu1 %v3192_v48 }
  0x3b   :  { %v2636_v9 = vld [vmem:[#allocation2 + $0x244] ss:$16 sps:$4 sm:$0xff]   ;;  %v2639_v11 = vld [vmem:[#allocation2 + $0x240] ss:$16 sps:$4 sm:$0xff]   ;;  %1355 = vmatprep.mubr.bf16.mxu0 %v3197_v52 }
  0x3c   :  { %1285 = vmatpush1.bf16.msra.mxu1 %v2632_v6  ;;  %v2640_v12 = vld [vmem:[#allocation2 + $0x64] ss:$16 sps:$4 sm:$0xff]   ;;  %v2644_v14 = vld [vmem:[#allocation2 + $0x60] ss:$16 sps:$4 sm:$0xff]  }
  0x3d   :  { %1326 = vmatpush1.bf16.msra.mxu0 %v2633_v7  ;;  %1286 = vmatprep.subr.bf16.mxu1 %v2634_v8  ;;  %v2642_v13 = vld [vmem:[#allocation2 + $0x264] ss:$16 sps:$4 sm:$0xff]   ;;  %v2645_v15 = vld [vmem:[#allocation2 + $0x260] ss:$16 sps:$4 sm:$0xff]   ;;  %v2723_v7 = vld [vmem:[#allocation2 + $0xc] ss:$16 sps:$4 sm:$0xff]  }
  0x3e   :  { %1327 = vmatprep.subr.bf16.mxu0 %v2636_v9  ;;  %v2646_v16 = vld [vmem:[#allocation2 + $0x84] ss:$16 sps:$4 sm:$0xff]   ;;  %v2650_v18 = vld [vmem:[#allocation2 + $0x80] ss:$16 sps:$4 sm:$0xff]  }
  0x3f   :  { %v2648_v17 = vld [vmem:[#allocation2 + $0x284] ss:$16 sps:$4 sm:$0xff]   ;;  %v2651_v19 = vld [vmem:[#allocation2 + $0x280] ss:$16 sps:$4 sm:$0xff]  }
  0x40   :  { %1287 = vmatpush1.bf16.msra.mxu1 %v2638_v10  ;;  %v2652_v20 = vld [vmem:[#allocation2 + $0xa4] ss:$16 sps:$4 sm:$0xff]   ;;  %v2656_v22 = vld [vmem:[#allocation2 + $0xa0] ss:$16 sps:$4 sm:$0xff]   ;;  %v2721_v10 = vld [vmem:[#allocation2 + $0x8] ss:$16 sps:$4 sm:$0xff]  }
  0x41   :  { %1328 = vmatpush1.bf16.msra.mxu0 %v2639_v11  ;;  %1288 = vmatprep.subr.bf16.mxu1 %v2640_v12  ;;  %v2654_v21 = vld [vmem:[#allocation2 + $0x2a4] ss:$16 sps:$4 sm:$0xff]   ;;  %v2657_v23 = vld [vmem:[#allocation2 + $0x2a0] ss:$16 sps:$4 sm:$0xff]  }
  0x42   :  { %1329 = vmatprep.subr.bf16.mxu0 %v2642_v13  ;;  %v2658_v24 = vld [vmem:[#allocation2 + $0xc4] ss:$16 sps:$4 sm:$0xff]   ;;  %v2662_v26 = vld [vmem:[#allocation2 + $0xc0] ss:$16 sps:$4 sm:$0xff]   ;;  %v2729_v13 = vld [vmem:[#allocation2 + $0x2c] ss:$16 sps:$4 sm:$0xff]  }
  0x43   :  { %v2660_v25 = vld [vmem:[#allocation2 + $0x2c4] ss:$16 sps:$4 sm:$0xff]   ;;  %v2663_v27 = vld [vmem:[#allocation2 + $0x2c0] ss:$16 sps:$4 sm:$0xff]  }
  0x44   :  { %1289 = vmatpush1.bf16.msra.mxu1 %v2644_v14  ;;  %v2664_v28 = vld [vmem:[#allocation2 + $0xe4] ss:$16 sps:$4 sm:$0xff]   ;;  %v2668_v30 = vld [vmem:[#allocation2 + $0xe0] ss:$16 sps:$4 sm:$0xff]  }
  0x45   :  { %1330 = vmatpush1.bf16.msra.mxu0 %v2645_v15  ;;  %1290 = vmatprep.subr.bf16.mxu1 %v2646_v16  ;;  %v2666_v29 = vld [vmem:[#allocation2 + $0x2e4] ss:$16 sps:$4 sm:$0xff]   ;;  %v2669_v31 = vld [vmem:[#allocation2 + $0x2e0] ss:$16 sps:$4 sm:$0xff]   ;;  %v2727_v15 = vld [vmem:[#allocation2 + $0x28] ss:$16 sps:$4 sm:$0xff]  }
  0x46   :  { %1331 = vmatprep.subr.bf16.mxu0 %v2648_v17  ;;  %v2670_v32 = vld [vmem:[#allocation2 + $0x104] ss:$16 sps:$4 sm:$0xff]   ;;  %v2674_v34 = vld [vmem:[#allocation2 + $0x100] ss:$16 sps:$4 sm:$0xff]   ;;  %v2735_v17 = vld [vmem:[#allocation2 + $0x4c] ss:$16 sps:$4 sm:$0xff]  }
  0x47   :  { %v2672_v33 = vld [vmem:[#allocation2 + $0x304] ss:$16 sps:$4 sm:$0xff]   ;;  %v2675_v35 = vld [vmem:[#allocation2 + $0x300] ss:$16 sps:$4 sm:$0xff]  }
  0x48   :  { %1291 = vmatpush1.bf16.msra.mxu1 %v2650_v18  ;;  %v2676_v36 = vld [vmem:[#allocation2 + $0x124] ss:$16 sps:$4 sm:$0xff]   ;;  %v2680_v38 = vld [vmem:[#allocation2 + $0x120] ss:$16 sps:$4 sm:$0xff]  }
  0x49   :  { %1332 = vmatpush1.bf16.msra.mxu0 %v2651_v19  ;;  %1292 = vmatprep.subr.bf16.mxu1 %v2652_v20  ;;  %v2678_v37 = vld [vmem:[#allocation2 + $0x324] ss:$16 sps:$4 sm:$0xff]   ;;  %v2681_v39 = vld [vmem:[#allocation2 + $0x320] ss:$16 sps:$4 sm:$0xff]   ;;  %v2733_v19 = vld [vmem:[#allocation2 + $0x48] ss:$16 sps:$4 sm:$0xff]  }
  0x4a   :  { %1333 = vmatprep.subr.bf16.mxu0 %v2654_v21  ;;  %v2682_v40 = vld [vmem:[#allocation2 + $0x144] ss:$16 sps:$4 sm:$0xff]   ;;  %v2686_v42 = vld [vmem:[#allocation2 + $0x140] ss:$16 sps:$4 sm:$0xff]   ;;  %v2741_v21 = vld [vmem:[#allocation2 + $0x6c] ss:$16 sps:$4 sm:$0xff]  }
  0x4b   :  { %v2684_v41 = vld [vmem:[#allocation2 + $0x344] ss:$16 sps:$4 sm:$0xff]   ;;  %v2687_v43 = vld [vmem:[#allocation2 + $0x340] ss:$16 sps:$4 sm:$0xff]  }
  0x4c   :  { %1293 = vmatpush1.bf16.msra.mxu1 %v2656_v22  ;;  %v2688_v44 = vld [vmem:[#allocation2 + $0x164] ss:$16 sps:$4 sm:$0xff]   ;;  %v2692_v47 = vld [vmem:[#allocation2 + $0x160] ss:$16 sps:$4 sm:$0xff]  }
  0x4d   :  { %1334 = vmatpush1.bf16.msra.mxu0 %v2657_v23  ;;  %1294 = vmatprep.subr.bf16.mxu1 %v2658_v24  ;;  %v2690_v45 = vld [vmem:[#allocation2 + $0x364] ss:$16 sps:$4 sm:$0xff]   ;;  %v2693_v50 = vld [vmem:[#allocation2 + $0x360] ss:$16 sps:$4 sm:$0xff]   ;;  %v2739_v23 = vld [vmem:[#allocation2 + $0x68] ss:$16 sps:$4 sm:$0xff]  }
  0x4e   :  { %1335 = vmatprep.subr.bf16.mxu0 %v2660_v25  ;;  %v2694_v51 = vld [vmem:[#allocation2 + $0x184] ss:$16 sps:$4 sm:$0xff]   ;;  %v2698_v54 = vld [vmem:[#allocation2 + $0x180] ss:$16 sps:$4 sm:$0xff]   ;;  %v2747_v25 = vld [vmem:[#allocation2 + $0x8c] ss:$16 sps:$4 sm:$0xff]  }
  0x4f   :  { %v2696_v53 = vld [vmem:[#allocation2 + $0x384] ss:$16 sps:$4 sm:$0xff]   ;;  %v2699_v55 = vld [vmem:[#allocation2 + $0x380] ss:$16 sps:$4 sm:$0xff]  }
  0x50   :  { %1295 = vmatpush1.bf16.msra.mxu1 %v2662_v26  ;;  %v2700_v56 = vld [vmem:[#allocation2 + $0x1a4] ss:$16 sps:$4 sm:$0xff]   ;;  %v2704_v58 = vld [vmem:[#allocation2 + $0x1a0] ss:$16 sps:$4 sm:$0xff]  }
  0x51   :  { %1336 = vmatpush1.bf16.msra.mxu0 %v2663_v27  ;;  %1296 = vmatprep.subr.bf16.mxu1 %v2664_v28  ;;  %v2702_v57 = vld [vmem:[#allocation2 + $0x3a4] ss:$16 sps:$4 sm:$0xff]   ;;  %v2705_v59 = vld [vmem:[#allocation2 + $0x3a0] ss:$16 sps:$4 sm:$0xff]   ;;  %v2745_v27 = vld [vmem:[#allocation2 + $0x88] ss:$16 sps:$4 sm:$0xff]  }
  0x52   :  { %1337 = vmatprep.subr.bf16.mxu0 %v2666_v29  ;;  %v2706_v60 = vld [vmem:[#allocation2 + $0x1c4] ss:$16 sps:$4 sm:$0xff]   ;;  %v2710_v62 = vld [vmem:[#allocation2 + $0x1c0] ss:$16 sps:$4 sm:$0xff]   ;;  %v2753_v29 = vld [vmem:[#allocation2 + $0xac] ss:$16 sps:$4 sm:$0xff]  }
  0x53   :  { %v2708_v61 = vld [vmem:[#allocation2 + $0x3c4] ss:$16 sps:$4 sm:$0xff]   ;;  %v2711_v63 = vld [vmem:[#allocation2 + $0x3c0] ss:$16 sps:$4 sm:$0xff]  }
  0x54   :  { %1297 = vmatpush1.bf16.msra.mxu1 %v2668_v30  ;;  %v2712_v0 = vld [vmem:[#allocation2 + $0x1e4] ss:$16 sps:$4 sm:$0xff]   ;;  %v2716_v2 = vld [vmem:[#allocation2 + $0x1e0] ss:$16 sps:$4 sm:$0xff]  }
  0x55   :  { %1338 = vmatpush1.bf16.msra.mxu0 %v2669_v31  ;;  %1298 = vmatprep.subr.bf16.mxu1 %v2670_v32  ;;  %v2714_v1 = vld [vmem:[#allocation2 + $0x3e4] ss:$16 sps:$4 sm:$0xff]   ;;  %v2717_v3 = vld [vmem:[#allocation2 + $0x3e0] ss:$16 sps:$4 sm:$0xff]   ;;  %v2751_v31 = vld [vmem:[#allocation2 + $0xa8] ss:$16 sps:$4 sm:$0xff]  }
  0x56   :  { %1339 = vmatprep.subr.bf16.mxu0 %v2672_v33  ;;  %v66_v4 = vld [vmem:[%s3317_s0] sm:$0xff]  ;;  %v68_v6 = vld [vmem:[%s3317_s0 + $0x10] sm:$0xff]  ;;  %v2759_v33 = vld [vmem:[#allocation2 + $0xcc] ss:$16 sps:$4 sm:$0xff]  }
  0x57   :  { %v2720_v5 = vld [vmem:[#allocation2 + $0x404] ss:$16 sps:$4 sm:$0xff]   ;;  %v3207_v8 = vpack.c.bf16 %v66_v4, %v66_v4  ;;  %v2718_v9 = vld [vmem:[#allocation2 + $0x400] ss:$16 sps:$4 sm:$0xff]   ;;  %v3209_v11 = vpack.c.bf16 %v68_v6, %v68_v6  ;;  %v2807_v4 = vld [vmem:[#allocation2 + $0x1cc] ss:$16 sps:$4 sm:$0xff]  }
  0x58   :  { %1299 = vmatpush1.bf16.msra.mxu1 %v2674_v34  ;;  %v2726_v12 = vld [vmem:[#allocation2 + $0x424] ss:$16 sps:$4 sm:$0xff]   ;;  %v2724_v14 = vld [vmem:[#allocation2 + $0x420] ss:$16 sps:$4 sm:$0xff]   ;;  %v71_v34 = vld [vmem:[%s3317_s0 + $0x28] sm:$0xff] }
  0x59   :  { %1340 = vmatpush1.bf16.msra.mxu0 %v2675_v35  ;;  %1300 = vmatprep.subr.bf16.mxu1 %v2676_v36  ;;  %v2732_v16 = vld [vmem:[#allocation2 + $0x444] ss:$16 sps:$4 sm:$0xff]   ;;  %v2730_v18 = vld [vmem:[#allocation2 + $0x440] ss:$16 sps:$4 sm:$0xff]   ;;  %v3217_v35 = vpack.c.bf16 %v71_v34, %v71_v34  ;;  %v2805_v6 = vld [vmem:[#allocation2 + $0x1c8] ss:$16 sps:$4 sm:$0xff]  }
  0x5a   :  { %1341 = vmatprep.subr.bf16.mxu0 %v2678_v37  ;;  %v2738_v20 = vld [vmem:[#allocation2 + $0x464] ss:$16 sps:$4 sm:$0xff]   ;;  %v2736_v22 = vld [vmem:[#allocation2 + $0x460] ss:$16 sps:$4 sm:$0xff]   ;;  %v2757_v37 = vld [vmem:[#allocation2 + $0xc8] ss:$16 sps:$4 sm:$0xff]  }
  0x5b   :  { %v2744_v24 = vld [vmem:[#allocation2 + $0x484] ss:$16 sps:$4 sm:$0xff]   ;;  %v2742_v26 = vld [vmem:[#allocation2 + $0x480] ss:$16 sps:$4 sm:$0xff]   ;;  %v2840_v34 = vld [vmem:[#allocation2 + $0x2ec] ss:$16 sps:$4 sm:$0xff]  }
  0x5c   :  { %1301 = vmatpush1.bf16.msra.mxu1 %v2680_v38  ;;  %v2750_v28 = vld [vmem:[#allocation2 + $0x4a4] ss:$16 sps:$4 sm:$0xff]   ;;  %v2748_v30 = vld [vmem:[#allocation2 + $0x4a0] ss:$16 sps:$4 sm:$0xff]  }
  0x5d   :  { %1342 = vmatpush1.bf16.msra.mxu0 %v2681_v39  ;;  %1302 = vmatprep.subr.bf16.mxu1 %v2682_v40  ;;  %v2756_v32 = vld [vmem:[#allocation2 + $0x4c4] ss:$16 sps:$4 sm:$0xff]   ;;  %v2754_v36 = vld [vmem:[#allocation2 + $0x4c0] ss:$16 sps:$4 sm:$0xff]   ;;  %v2765_v39 = vld [vmem:[#allocation2 + $0xec] ss:$16 sps:$4 sm:$0xff]  }
  0x5e   :  { %1343 = vmatprep.subr.bf16.mxu0 %v2684_v41  ;;  %v2762_v38 = vld [vmem:[#allocation2 + $0x4e4] ss:$16 sps:$4 sm:$0xff]   ;;  %v2760_v40 = vld [vmem:[#allocation2 + $0x4e0] ss:$16 sps:$4 sm:$0xff]   ;;  %v2763_v41 = vld [vmem:[#allocation2 + $0xe8] ss:$16 sps:$4 sm:$0xff]  }
  0x5f   :  { %v2774_v46 = vld [vmem:[#allocation2 + $0x524] ss:$16 sps:$4 sm:$0xff]  }
  0x60   :  { %1303 = vmatpush1.bf16.msra.mxu1 %v2686_v42  ;;  %v2768_v42 = vld [vmem:[#allocation2 + $0x504] ss:$16 sps:$4 sm:$0xff]  }
  0x61   :  { %1344 = vmatpush1.bf16.msra.mxu0 %v2687_v43  ;;  %1304 = vmatprep.subr.bf16.mxu1 %v2688_v44  ;;  %v2771_v43 = vld [vmem:[#allocation2 + $0x10c] ss:$16 sps:$4 sm:$0xff]   ;;  %v2766_v44 = vld [vmem:[#allocation2 + $0x500] ss:$16 sps:$4 sm:$0xff]  }
  0x62   :  { %1345 = vmatprep.subr.bf16.mxu0 %v2690_v45  ;;  %v2769_v45 = vld [vmem:[#allocation2 + $0x108] ss:$16 sps:$4 sm:$0xff]  }
  0x64   :  { %1305 = vmatpush1.bf16.msra.mxu1 %v2692_v47  ;;  %v2777_v47 = vld [vmem:[#allocation2 + $0x12c] ss:$16 sps:$4 sm:$0xff]  }
  0x65   :  { %1346 = vmatpush1.bf16.msra.mxu0 %v2693_v50  ;;  %1306 = vmatprep.subr.bf16.mxu1 %v2694_v51  ;;  %v2780_v50 = vld [vmem:[#allocation2 + $0x544] ss:$16 sps:$4 sm:$0xff]   ;;  %v2783_v51 = vld [vmem:[#allocation2 + $0x14c] ss:$16 sps:$4 sm:$0xff]  }
  0x66   :  { %1347 = vmatprep.subr.bf16.mxu0 %v2696_v53  ;;  %v2778_v53 = vld [vmem:[#allocation2 + $0x540] ss:$16 sps:$4 sm:$0xff]  }
  0x68   :  { %1307 = vmatpush1.bf16.msra.mxu1 %v2698_v54  ;;  %v2781_v54 = vld [vmem:[#allocation2 + $0x148] ss:$16 sps:$4 sm:$0xff]  }
  0x69   :  { %1348 = vmatpush1.bf16.msra.mxu0 %v2699_v55  ;;  %1308 = vmatprep.subr.bf16.mxu1 %v2700_v56  ;;  %v2786_v55 = vld [vmem:[#allocation2 + $0x564] ss:$16 sps:$4 sm:$0xff]   ;;  %v2789_v56 = vld [vmem:[#allocation2 + $0x16c] ss:$16 sps:$4 sm:$0xff]  }
  0x6a   :  { %1349 = vmatprep.subr.bf16.mxu0 %v2702_v57  ;;  %v2784_v57 = vld [vmem:[#allocation2 + $0x560] ss:$16 sps:$4 sm:$0xff]  }
  0x6c   :  { %1309 = vmatpush1.bf16.msra.mxu1 %v2704_v58  ;;  %v2787_v58 = vld [vmem:[#allocation2 + $0x168] ss:$16 sps:$4 sm:$0xff]  }
  0x6d   :  { %1350 = vmatpush1.bf16.msra.mxu0 %v2705_v59  ;;  %1310 = vmatprep.subr.bf16.mxu1 %v2706_v60  ;;  %v2792_v59 = vld [vmem:[#allocation2 + $0x584] ss:$16 sps:$4 sm:$0xff]   ;;  %v2795_v60 = vld [vmem:[#allocation2 + $0x18c] ss:$16 sps:$4 sm:$0xff]  }
  0x6e   :  { %1351 = vmatprep.subr.bf16.mxu0 %v2708_v61  ;;  %v2790_v61 = vld [vmem:[#allocation2 + $0x580] ss:$16 sps:$4 sm:$0xff]  }
  0x70   :  { %1311 = vmatpush1.bf16.msra.mxu1 %v2710_v62  ;;  %v2793_v62 = vld [vmem:[#allocation2 + $0x188] ss:$16 sps:$4 sm:$0xff]  }
  0x71   :  { %1352 = vmatpush1.bf16.msra.mxu0 %v2711_v63  ;;  %1312 = vmatprep.subr.bf16.mxu1 %v2712_v0  ;;  %v2798_v63 = vld [vmem:[#allocation2 + $0x5a4] ss:$16 sps:$4 sm:$0xff]   ;;  %v2801_v0 = vld [vmem:[#allocation2 + $0x1ac] ss:$16 sps:$4 sm:$0xff]  }
  0x72   :  { %1353 = vmatprep.subr.bf16.mxu0 %v2714_v1  ;;  %v2796_v1 = vld [vmem:[#allocation2 + $0x5a0] ss:$16 sps:$4 sm:$0xff]  }
  0x74   :  { %1313 = vmatpush1.bf16.msra.mxu1 %v2716_v2  ;;  %v2799_v2 = vld [vmem:[#allocation2 + $0x1a8] ss:$16 sps:$4 sm:$0xff]  }
  0x75   :  { %1354 = vmatpush1.bf16.msra.mxu0 %v2717_v3  ;;  %1446 = vmatprep.subr.bf16.mxu1 %v2723_v7  ;;  %v2804_v3 = vld [vmem:[#allocation2 + $0x5c4] ss:$16 sps:$4 sm:$0xff]  }
  0x76   :  { %1364 = vmatprep.subr.bf16.mxu0 %v2720_v5  ;;  %v2802_v5 = vld [vmem:[#allocation2 + $0x5c0] ss:$16 sps:$4 sm:$0xff]   ;;  %v2810_v7 = vld [vmem:[#allocation2 + $0x5e4] ss:$16 sps:$4 sm:$0xff]  }
  0x77   :  { %1315 = vmatmul.mubr.bf16.vlgmr.msra.gmra.mrb[0].mxu1 %v3207_v8 }
  0x78   :  { %1356 = vmatmul.mubr.bf16.vlgmr.msra.gmra.mrb[0].mxu0 %v3209_v11  ;;  %1447 = vmatpush1.bf16.msra.mxu1 %v2721_v10  ;;  %v2808_v10 = vld [vmem:[#allocation2 + $0x5e0] ss:$16 sps:$4 sm:$0xff]  }
  0x79   :  { %1365 = vmatpush1.bf16.msra.mxu0 %v2718_v9  ;;  %1448 = vmatprep.subr.bf16.mxu1 %v2729_v13  ;;  %v2813_v9 = vld [vmem:[#allocation2 + $0x1ec] ss:$16 sps:$4 sm:$0xff]   ;;  %v70_v13 = vld [vmem:[%s3317_s0 + $0x20] sm:$0xff] }
  0x7a   :  { %1366 = vmatprep.subr.bf16.mxu0 %v2726_v12  ;;  %1478 = vmatprep.mubr.bf16.mxu1 %v3192_v48  ;;  %v2772_v48 = vld [vmem:[#allocation2 + $0x520] ss:$16 sps:$4 sm:$0xff]   ;;  %v2811_v12 = vld [vmem:[#allocation2 + $0x1e8] ss:$16 sps:$4 sm:$0xff]  }
  0x7b   :  { %1396 = vmatprep.mubr.bf16.mxu0 %v3217_v35 }
  0x7c   :  { %1449 = vmatpush1.bf16.msra.mxu1 %v2727_v15  ;;  %v2822_v15 = vld [vmem:[#allocation2 + $0x604] ss:$16 sps:$4 sm:$0xff]  }
  0x7d   :  { %1367 = vmatpush1.bf16.msra.mxu0 %v2724_v14  ;;  %1450 = vmatprep.subr.bf16.mxu1 %v2735_v17  ;;  %v2816_v14 = vld [vmem:[#allocation2 + $0x20c] ss:$16 sps:$4 sm:$0xff]   ;;  %v2814_v17 = vld [vmem:[#allocation2 + $0x208] ss:$16 sps:$4 sm:$0xff]  }
  0x7e   :  { %1368 = vmatprep.subr.bf16.mxu0 %v2732_v16  ;;  %v3223_v16 = vpack.c.bf16 %v70_v13, %v70_v13  ;;  %v2948_v13 = vld [vmem:[#allocation6 + $0xa4] ss:$8 sps:$4 sm:$0xff]  }
  0x80   :  { %1451 = vmatpush1.bf16.msra.mxu1 %v2733_v19  ;;  %v2819_v19 = vld [vmem:[#allocation2 + $0x22c] ss:$16 sps:$4 sm:$0xff]  }
  0x81   :  { %1369 = vmatpush1.bf16.msra.mxu0 %v2730_v18  ;;  %1452 = vmatprep.subr.bf16.mxu1 %v2741_v21  ;;  %v2820_v18 = vld [vmem:[#allocation2 + $0x600] ss:$16 sps:$4 sm:$0xff]   ;;  %v2817_v21 = vld [vmem:[#allocation2 + $0x228] ss:$16 sps:$4 sm:$0xff]  }
  0x82   :  { %1370 = vmatprep.subr.bf16.mxu0 %v2738_v20  ;;  %v2912_v20 = vld [vmem:[#allocation2 + $0x60c] ss:$16 sps:$4 sm:$0xff]  }
  0x84   :  { %1453 = vmatpush1.bf16.msra.mxu1 %v2739_v23  ;;  %v3105_v23 = vmov 0  }
  0x85   :  { %1371 = vmatpush1.bf16.msra.mxu0 %v2736_v22  ;;  %1454 = vmatprep.subr.bf16.mxu1 %v2747_v25  ;;  %v2825_v22 = vld [vmem:[#allocation2 + $0x24c] ss:$16 sps:$4 sm:$0xff]   ;;  %v72_v25 = vld [vmem:[%s3317_s0 + $0x30] sm:$0xff] }
  0x86   :  { %1372 = vmatprep.subr.bf16.mxu0 %v2744_v24  ;;  %v2823_v24 = vld [vmem:[#allocation2 + $0x248] ss:$16 sps:$4 sm:$0xff]  }
  0x88   :  { %1455 = vmatpush1.bf16.msra.mxu1 %v2745_v27  ;;  %v2910_v27 = vld [vmem:[#allocation2 + $0x608] ss:$16 sps:$4 sm:$0xff]  }
  0x89   :  { %1373 = vmatpush1.bf16.msra.mxu0 %v2742_v26  ;;  %1456 = vmatprep.subr.bf16.mxu1 %v2753_v29  ;;  %v2828_v26 = vld [vmem:[#allocation2 + $0x26c] ss:$16 sps:$4 sm:$0xff]  }
  0x8a   :  { %1374 = vmatprep.subr.bf16.mxu0 %v2750_v28  ;;  %v79_v28 = vpack.c.bf16 %v72_v25, %v72_v25  ;;  %v2831_v29 = vld [vmem:[#allocation2 + $0x28c] ss:$16 sps:$4 sm:$0xff]  }
  0x8b   :  { %v2952_v25 = vld [vmem:[#allocation6 + $0xc0] ss:$8 sps:$4 sm:$0xff]  }
  0x8c   :  { %1457 = vmatpush1.bf16.msra.mxu1 %v2751_v31  ;;  %v2834_v31 = vld [vmem:[#allocation2 + $0x2ac] ss:$16 sps:$4 sm:$0xff]  }
  0x8d   :  { %1375 = vmatpush1.bf16.msra.mxu0 %v2748_v30  ;;  %1458 = vmatprep.subr.bf16.mxu1 %v2759_v33  ;;  %v2829_v30 = vld [vmem:[#allocation2 + $0x288] ss:$16 sps:$4 sm:$0xff]  }
  0x8e   :  { %1376 = vmatprep.subr.bf16.mxu0 %v2756_v32  ;;  %v2832_v32 = vld [vmem:[#allocation2 + $0x2a8] ss:$16 sps:$4 sm:$0xff]  }
  0x8f   :  { %v2835_v33 = vld [vmem:[#allocation2 + $0x2c8] ss:$16 sps:$4 sm:$0xff]  }
  0x90   :  { %1459 = vmatpush1.bf16.msra.mxu1 %v2757_v37  ;;  %v2918_v37 = vld [vmem:[#allocation6 + $0x4] ss:$8 sps:$4 sm:$0xff]  }
  0x91   :  { %1377 = vmatpush1.bf16.msra.mxu0 %v2754_v36  ;;  %1460 = vmatprep.subr.bf16.mxu1 %v2765_v39  ;;  %v2916_v36 = vld [vmem:[#allocation6] ss:$8 sps:$4 sm:$0xff]   ;;  %v2838_v39 = vld [vmem:[#allocation2 + $0x2e8] ss:$16 sps:$4 sm:$0xff]  }
  0x92   :  { %1378 = vmatprep.subr.bf16.mxu0 %v2762_v38  ;;  %v2921_v38 = vld [vmem:[#allocation6 + $0x14] ss:$8 sps:$4 sm:$0xff]  }
  0x94   :  { %1461 = vmatpush1.bf16.msra.mxu1 %v2763_v41  ;;  %v2843_v41 = vld [vmem:[#allocation2 + $0x30c] ss:$16 sps:$4 sm:$0xff]  }
  0x95   :  { %1379 = vmatpush1.bf16.msra.mxu0 %v2760_v40  ;;  %1462 = vmatprep.subr.bf16.mxu1 %v2771_v43  ;;  %v2919_v40 = vld [vmem:[#allocation6 + $0x10] ss:$8 sps:$4 sm:$0xff]   ;;  %v2841_v43 = vld [vmem:[#allocation2 + $0x308] ss:$16 sps:$4 sm:$0xff]  }
  0x96   :  { %1380 = vmatprep.subr.bf16.mxu0 %v2768_v42  ;;  %v2924_v42 = vld [vmem:[#allocation6 + $0x24] ss:$8 sps:$4 sm:$0xff]  }
  0x98   :  { %1463 = vmatpush1.bf16.msra.mxu1 %v2769_v45  ;;  %v2846_v45 = vld [vmem:[#allocation2 + $0x32c] ss:$16 sps:$4 sm:$0xff]  }
  0x99   :  { %1381 = vmatpush1.bf16.msra.mxu0 %v2766_v44  ;;  %1464 = vmatprep.subr.bf16.mxu1 %v2777_v47  ;;  %v2922_v44 = vld [vmem:[#allocation6 + $0x20] ss:$8 sps:$4 sm:$0xff]   ;;  %v2844_v47 = vld [vmem:[#allocation2 + $0x328] ss:$16 sps:$4 sm:$0xff]  }
  0x9a   :  { %1382 = vmatprep.subr.bf16.mxu0 %v2774_v46  ;;  %v2927_v46 = vld [vmem:[#allocation6 + $0x34] ss:$8 sps:$4 sm:$0xff]  }
  0x9c   :  { %1465 = vmatpush1.bf16.msra.mxu1 %v2775_v49  ;;  %v2849_v49 = vld [vmem:[#allocation2 + $0x34c] ss:$16 sps:$4 sm:$0xff]  }
  0x9d   :  { %1383 = vmatpush1.bf16.msra.mxu0 %v2772_v48  ;;  %1466 = vmatprep.subr.bf16.mxu1 %v2783_v51  ;;  %v2925_v48 = vld [vmem:[#allocation6 + $0x30] ss:$8 sps:$4 sm:$0xff]   ;;  %v2847_v51 = vld [vmem:[#allocation2 + $0x348] ss:$16 sps:$4 sm:$0xff]  }
  0x9e   :  { %1384 = vmatprep.subr.bf16.mxu0 %v2780_v50  ;;  %v2930_v50 = vld [vmem:[#allocation6 + $0x44] ss:$8 sps:$4 sm:$0xff]  }
  0xa0   :  { %1467 = vmatpush1.bf16.msra.mxu1 %v2781_v54  ;;  %v2852_v54 = vld [vmem:[#allocation2 + $0x36c] ss:$16 sps:$4 sm:$0xff]  }
  0xa1   :  { %1385 = vmatpush1.bf16.msra.mxu0 %v2778_v53  ;;  %1468 = vmatprep.subr.bf16.mxu1 %v2789_v56  ;;  %v2928_v53 = vld [vmem:[#allocation6 + $0x40] ss:$8 sps:$4 sm:$0xff]   ;;  %v2850_v56 = vld [vmem:[#allocation2 + $0x368] ss:$16 sps:$4 sm:$0xff]  }
  0xa2   :  { %1386 = vmatprep.subr.bf16.mxu0 %v2786_v55  ;;  %v2933_v55 = vld [vmem:[#allocation6 + $0x54] ss:$8 sps:$4 sm:$0xff]  }
  0xa4   :  { %1469 = vmatpush1.bf16.msra.mxu1 %v2787_v58  ;;  %v2855_v58 = vld [vmem:[#allocation2 + $0x38c] ss:$16 sps:$4 sm:$0xff]  }
  0xa5   :  { %1387 = vmatpush1.bf16.msra.mxu0 %v2784_v57  ;;  %1470 = vmatprep.subr.bf16.mxu1 %v2795_v60  ;;  %v2931_v57 = vld [vmem:[#allocation6 + $0x50] ss:$8 sps:$4 sm:$0xff]   ;;  %v2853_v60 = vld [vmem:[#allocation2 + $0x388] ss:$16 sps:$4 sm:$0xff]  }
  0xa6   :  { %1388 = vmatprep.subr.bf16.mxu0 %v2792_v59  ;;  %v2936_v59 = vld [vmem:[#allocation6 + $0x64] ss:$8 sps:$4 sm:$0xff]  }
  0xa8   :  { %1471 = vmatpush1.bf16.msra.mxu1 %v2793_v62  ;;  %v2858_v62 = vld [vmem:[#allocation2 + $0x3ac] ss:$16 sps:$4 sm:$0xff]  }
  0xa9   :  { %1389 = vmatpush1.bf16.msra.mxu0 %v2790_v61  ;;  %1472 = vmatprep.subr.bf16.mxu1 %v2801_v0  ;;  %v2934_v61 = vld [vmem:[#allocation6 + $0x60] ss:$8 sps:$4 sm:$0xff]   ;;  %v2856_v0 = vld [vmem:[#allocation2 + $0x3a8] ss:$16 sps:$4 sm:$0xff]  }
  0xaa   :  { %1390 = vmatprep.subr.bf16.mxu0 %v2798_v63  ;;  %v2939_v63 = vld [vmem:[#allocation6 + $0x74] ss:$8 sps:$4 sm:$0xff]  }
  0xac   :  { %1473 = vmatpush1.bf16.msra.mxu1 %v2799_v2  ;;  %v2861_v2 = vld [vmem:[#allocation2 + $0x3cc] ss:$16 sps:$4 sm:$0xff]  }
  0xad   :  { %1391 = vmatpush1.bf16.msra.mxu0 %v2796_v1  ;;  %1474 = vmatprep.subr.bf16.mxu1 %v2807_v4  ;;  %v2937_v1 = vld [vmem:[#allocation6 + $0x70] ss:$8 sps:$4 sm:$0xff]   ;;  %v2859_v4 = vld [vmem:[#allocation2 + $0x3c8] ss:$16 sps:$4 sm:$0xff]  }
  0xae   :  { %1392 = vmatprep.subr.bf16.mxu0 %v2804_v3  ;;  %v2942_v3 = vld [vmem:[#allocation6 + $0x84] ss:$8 sps:$4 sm:$0xff]  }
  0xb0   :  { %1475 = vmatpush1.bf16.msra.mxu1 %v2805_v6  ;;  %v2864_v6 = vld [vmem:[#allocation2 + $0x3ec] ss:$16 sps:$4 sm:$0xff]  }
  0xb1   :  { %1393 = vmatpush1.bf16.msra.mxu0 %v2802_v5  ;;  %1476 = vmatprep.subr.bf16.mxu1 %v2813_v9  ;;  %v2940_v5 = vld [vmem:[#allocation6 + $0x80] ss:$8 sps:$4 sm:$0xff]   ;;  %v2862_v9 = vld [vmem:[#allocation2 + $0x3e8] ss:$16 sps:$4 sm:$0xff]  }
  0xb2   :  { %1394 = vmatprep.subr.bf16.mxu0 %v2810_v7  ;;  %v2945_v7 = vld [vmem:[#allocation6 + $0x94] ss:$8 sps:$4 sm:$0xff]  }
  0xb4   :  { %1477 = vmatpush1.bf16.msra.mxu1 %v2811_v12  ;;  %v2867_v12 = vld [vmem:[#allocation2 + $0x40c] ss:$16 sps:$4 sm:$0xff]  }
  0xb5   :  { %1395 = vmatpush1.bf16.msra.mxu0 %v2808_v10  ;;  %1487 = vmatprep.subr.bf16.mxu1 %v2816_v14  ;;  %v2943_v10 = vld [vmem:[#allocation6 + $0x90] ss:$8 sps:$4 sm:$0xff]   ;;  %v2865_v14 = vld [vmem:[#allocation2 + $0x408] ss:$16 sps:$4 sm:$0xff]  }
  0xb6   :  { %1405 = vmatprep.subr.bf16.mxu0 %v2822_v15  ;;  %v2870_v15 = vld [vmem:[#allocation2 + $0x42c] ss:$16 sps:$4 sm:$0xff]  }
  0xb7   :  { %1479 = vmatmul.mubr.bf16.vlgmr.msra.gmra.mrb[4].mxu1 %v3207_v8  ;;  %v2826_v8 = vld [vmem:[#allocation2 + $0x268] ss:$16 sps:$4 sm:$0xff]  }
  0xb8   :  { %1397 = vmatmul.mubr.bf16.vlgmr.msra.gmra.mrb[0].mxu0 %v3223_v16  ;;  %1488 = vmatpush1.bf16.msra.mxu1 %v2814_v17  ;;  %v2946_v17 = vld [vmem:[#allocation6 + $0xa0] ss:$8 sps:$4 sm:$0xff]  }
  0xb9   :  { %1406 = vmatpush1.bf16.msra.mxu0 %v2820_v18  ;;  %1489 = vmatprep.subr.bf16.mxu1 %v2819_v19  ;;  %v2951_v18 = vld [vmem:[#allocation6 + $0xb4] ss:$8 sps:$4 sm:$0xff]  }
  0xba   :  { %1437 = vmatprep.mubr.bf16.mxu0 %v3105_v23  ;;  %1519 = vmatprep.mubr.bf16.mxu1 %v3197_v52  ;;  %v2837_v52 = vld [vmem:[#allocation2 + $0x2cc] ss:$16 sps:$4 sm:$0xff]   ;;  %v2868_v19 = vld [vmem:[#allocation2 + $0x428] ss:$16 sps:$4 sm:$0xff]  }
  0xbb   :  { %1569 = vmatprep.subr.bf16.mxu0 %v2912_v20  ;;  %v2873_v20 = vld [vmem:[#allocation2 + $0x44c] ss:$16 sps:$4 sm:$0xff]  }
  0xbc   :  { %1490 = vmatpush1.bf16.msra.mxu1 %v2817_v21  ;;  %v2949_v21 = vld [vmem:[#allocation6 + $0xb0] ss:$8 sps:$4 sm:$0xff]  }
  0xbd   :  { %1491 = vmatprep.subr.bf16.mxu1 %v2825_v22  ;;  %v2954_v22 = vld [vmem:[#allocation6 + $0xc4] ss:$8 sps:$4 sm:$0xff]  }
  0xc0   :  { %1492 = vmatpush1.bf16.msra.mxu1 %v2823_v24  ;;  %v2876_v24 = vld [vmem:[#allocation2 + $0x46c] ss:$16 sps:$4 sm:$0xff]  }
  0xc1   :  { %1493 = vmatprep.subr.bf16.mxu1 %v2828_v26  ;;  %v2957_v26 = vld [vmem:[#allocation6 + $0xd4] ss:$8 sps:$4 sm:$0xff]  }
  0xc4   :  { %2479 = vmatmul.mubr.msk.bf16.vlgmr.msra.gmra.mrb[0].mxu0 %vm1278_vm0, %v79_v28  ;;  %1494 = vmatpush1.bf16.msra.mxu1 %v2826_v8  ;;  %v2879_v8 = vld [vmem:[#allocation2 + $0x48c] ss:$16 sps:$4 sm:$0xff]  }
  0xc5   :  { %1570 = vmatpush1.bf16.msra.mxu0 %v2910_v27  ;;  %1495 = vmatprep.subr.bf16.mxu1 %v2831_v29  ;;  %v2877_v27 = vld [vmem:[#allocation2 + $0x488] ss:$16 sps:$4 sm:$0xff]  }
  0xc6   :  { %1601 = vmatprep.mubr.bf16.mxu0 %v3105_v23  ;;  %2014 = vmatprep.subr.bf16.mxu0 %v2918_v37  ;;  %v2871_v23 = vld [vmem:[#allocation2 + $0x448] ss:$16 sps:$4 sm:$0xff]  }
  0xc7   :  { %v2880_v29 = vld [vmem:[#allocation2 + $0x4a8] ss:$16 sps:$4 sm:$0xff]  }
  0xc8   :  { %1496 = vmatpush1.bf16.msra.mxu1 %v2829_v30  ;;  %v2885_v30 = vld [vmem:[#allocation2 + $0x4cc] ss:$16 sps:$4 sm:$0xff]   ;;  %v2960_v37 = vld [vmem:[#allocation6 + $0xe4] ss:$8 sps:$4 sm:$0xff]  }
  0xc9   :  { %1497 = vmatprep.subr.bf16.mxu1 %v2834_v31  ;;  %v2883_v31 = vld [vmem:[#allocation2 + $0x4c8] ss:$16 sps:$4 sm:$0xff]  }
  0xcc   :  { %2480 = vmatmul.mubr.msk.bf16.vlgmr.msra.gmra.mrb[4].mxu0 %vm1278_vm0, %v79_v28  ;;  %1498 = vmatpush1.bf16.msra.mxu1 %v2832_v32  ;;  %v2882_v28 = vld [vmem:[#allocation2 + $0x4ac] ss:$16 sps:$4 sm:$0xff]  }
  0xcd   :  { %1499 = vmatprep.subr.bf16.mxu1 %v2837_v52  ;;  %2015 = vmatpush1.bf16.msra.mxu0 %v2916_v36  ;;  %v2888_v32 = vld [vmem:[#allocation2 + $0x4ec] ss:$16 sps:$4 sm:$0xff]   ;;  %v2886_v52 = vld [vmem:[#allocation2 + $0x4e8] ss:$16 sps:$4 sm:$0xff]  }
  0xce   :  { %2016 = vmatprep.subr.bf16.mxu0 %v2921_v38  ;;  %v2894_v36 = vld [vmem:[#allocation2 + $0x52c] ss:$16 sps:$4 sm:$0xff]  }
  0xcf   :  { %v2958_v38 = vld [vmem:[#allocation6 + $0xe0] ss:$8 sps:$4 sm:$0xff]  }
  0xd0   :  { %1500 = vmatpush1.bf16.msra.mxu1 %v2835_v33  ;;  %v2891_v33 = vld [vmem:[#allocation2 + $0x50c] ss:$16 sps:$4 sm:$0xff]  }
  0xd1   :  { %1501 = vmatprep.subr.bf16.mxu1 %v2840_v34  ;;  %2017 = vmatpush1.bf16.msra.mxu0 %v2919_v40  ;;  %v2889_v34 = vld [vmem:[#allocation2 + $0x508] ss:$16 sps:$4 sm:$0xff]   ;;  %v2897_v40 = vld [vmem:[#allocation2 + $0x54c] ss:$16 sps:$4 sm:$0xff]  }
  0xd2   :  { %2018 = vmatprep.subr.bf16.mxu0 %v2924_v42  ;;  %v2961_v42 = vld [vmem:[#allocation6 + $0xf0] ss:$8 sps:$4 sm:$0xff]  }
  0xd4   :  { %1502 = vmatpush1.bf16.msra.mxu1 %v2838_v39  ;;  %v2892_v39 = vld [vmem:[#allocation2 + $0x528] ss:$16 sps:$4 sm:$0xff]  }
  0xd5   :  { %1503 = vmatprep.subr.bf16.mxu1 %v2843_v41  ;;  %2019 = vmatpush1.bf16.msra.mxu0 %v2922_v44  ;;  %v2963_v41 = vld [vmem:[#allocation6 + $0xf4] ss:$8 sps:$4 sm:$0xff]   ;;  %v2900_v44 = vld [vmem:[#allocation2 + $0x56c] ss:$16 sps:$4 sm:$0xff]  }
  0xd6   :  { %2020 = vmatprep.subr.bf16.mxu0 %v2927_v46  ;;  %v2898_v46 = vld [vmem:[#allocation2 + $0x568] ss:$16 sps:$4 sm:$0xff]  }
  0xd8   :  { %1504 = vmatpush1.bf16.msra.mxu1 %v2841_v43  ;;  %v2895_v43 = vld [vmem:[#allocation2 + $0x548] ss:$16 sps:$4 sm:$0xff]  }
  0xd9   :  { %1505 = vmatprep.subr.bf16.mxu1 %v2846_v45  ;;  %2021 = vmatpush1.bf16.msra.mxu0 %v2925_v48  ;;  %v2966_v45 = vld [vmem:[#allocation6 + $0x104] ss:$8 sps:$4 sm:$0xff]  }
  0xda   :  { %2022 = vmatprep.subr.bf16.mxu0 %v2930_v50  ;;  %v2901_v48 = vld [vmem:[#allocation2 + $0x588] ss:$16 sps:$4 sm:$0xff]  }
  0xdb   :  { %v2904_v50 = vld [vmem:[#allocation2 + $0x5a8] ss:$16 sps:$4 sm:$0xff]  }
  0xdc   :  { %1506 = vmatpush1.bf16.msra.mxu1 %v2844_v47  ;;  %v2903_v47 = vld [vmem:[#allocation2 + $0x58c] ss:$16 sps:$4 sm:$0xff]  }
  0xdd   :  { %1507 = vmatprep.subr.bf16.mxu1 %v2849_v49  ;;  %2023 = vmatpush1.bf16.msra.mxu0 %v2928_v53  ;;  %v2906_v49 = vld [vmem:[#allocation2 + $0x5ac] ss:$16 sps:$4 sm:$0xff]   ;;  %v2907_v53 = vld [vmem:[#allocation2 + $0x5c8] ss:$16 sps:$4 sm:$0xff]  }
  0xde   :  { %2024 = vmatprep.subr.bf16.mxu0 %v2933_v55  ;;  %v2913_v55 = vld [vmem:[#allocation2 + $0x5e8] ss:$16 sps:$4 sm:$0xff]  }
  0xe0   :  { %1508 = vmatpush1.bf16.msra.mxu1 %v2847_v51  ;;  %v2909_v51 = vld [vmem:[#allocation2 + $0x5cc] ss:$16 sps:$4 sm:$0xff]  }
  0xe1   :  { %1509 = vmatprep.subr.bf16.mxu1 %v2852_v54  ;;  %2025 = vmatpush1.bf16.msra.mxu0 %v2931_v57  ;;  %v2915_v54 = vld [vmem:[#allocation2 + $0x5ec] ss:$16 sps:$4 sm:$0xff]  }
  0xe2   :  { %2026 = vmatprep.subr.bf16.mxu0 %v2936_v59 }
  0xe4   :  { %1510 = vmatpush1.bf16.msra.mxu1 %v2850_v56 }
  0xe5   :  { %1511 = vmatprep.subr.bf16.mxu1 %v2855_v58  ;;  %2027 = vmatpush1.bf16.msra.mxu0 %v2934_v61 }
  0xe6   :  { %2028 = vmatprep.subr.bf16.mxu0 %v2939_v63  ;;  %v3237_v63 = vld [vmem:[#allocation4] sm:$0xf] }
  0xe8   :  { %1512 = vmatpush1.bf16.msra.mxu1 %v2853_v60  ;;  %v278_v60 = vlaneseq }
  0xe9   :  { %1513 = vmatprep.subr.bf16.mxu1 %v2858_v62  ;;  %2029 = vmatpush1.bf16.msra.mxu0 %v2937_v1 }
  0xea   :  { %2030 = vmatprep.subr.bf16.mxu0 %v2942_v3  ;;  %v3234_v61 = vshrl.u32 %v278_v60, 7  ;;  %v3012_v3 = vld [vmem:[%s3322_s5 + $0x40] sm:$0xff]  }
  0xeb   :  { %v3011_v60 = vld [vmem:[#allocation6 + $0x1f4] ss:$8 sps:$4 sm:$0xff]  }
  0xec   :  { %1514 = vmatpush1.bf16.msra.mxu1 %v2856_v0  ;;  %v280_v62 = vsub.s32 0, %v3234_v61  ;;  %v284_v0 = vsub.s32 1, %v3234_v61 }
  0xed   :  { %1515 = vmatprep.subr.bf16.mxu1 %v2861_v2  ;;  %2031 = vmatpush1.bf16.msra.mxu0 %v2940_v5  ;;  %v3014_v5 = vld [vmem:[%s3322_s5 + $0x48] sm:$0xff]  }
  0xee   :  { %2032 = vmatprep.subr.bf16.mxu0 %v2945_v7  ;;  %v281_v1 = vrot.slane %v3237_v63, %v280_v62 }
  0xf0   :  { %1516 = vmatpush1.bf16.msra.mxu1 %v2859_v4  ;;  %v3013_v4 = vld [vmem:[%s3322_s5] sm:$0xff]  }
  0xf1   :  { %1517 = vmatprep.subr.bf16.mxu1 %v2864_v6  ;;  %2033 = vmatpush1.bf16.msra.mxu0 %v2943_v10 }
  0xf2   :  { %2034 = vmatprep.subr.bf16.mxu0 %v2948_v13 }
  0xf4   :  { %1518 = vmatpush1.bf16.msra.mxu1 %v2862_v9 }
  0xf5   :  { %1528 = vmatprep.subr.bf16.mxu1 %v2867_v12  ;;  %2035 = vmatpush1.bf16.msra.mxu0 %v2946_v17 }
  0xf6   :  { %2036 = vmatprep.subr.bf16.mxu0 %v2951_v18  ;;  %v3016_v18 = vld [vmem:[%s3322_s5 + $0x50] sm:$0xff]  }
  0xf7   :  { %1520 = vmatmul.mubr.bf16.vlgmr.msra.gmra.mrb[4].mxu1 %v3209_v11  ;;  %v2874_v11 = vld [vmem:[#allocation2 + $0x468] ss:$16 sps:$4 sm:$0xff]  }
  0xf8   :  { %1529 = vmatpush1.bf16.msra.mxu1 %v2865_v14  ;;  %1560 = vmatprep.mubr.bf16.mxu1 %v3217_v35  ;;  %v2955_v35 = vld [vmem:[#allocation6 + $0xd0] ss:$8 sps:$4 sm:$0xff]   ;;  %v3015_v14 = vld [vmem:[%s3322_s5 + $0x8] sm:$0xff]  }
  0xf9   :  { %1530 = vmatprep.subr.bf16.mxu1 %v2870_v15  ;;  %2037 = vmatpush1.bf16.msra.mxu0 %v2949_v21  ;;  %v2964_v21 = vld [vmem:[#allocation6 + $0x100] ss:$8 sps:$4 sm:$0xff]  }
  0xfa   :  { %2038 = vmatprep.subr.bf16.mxu0 %v2954_v22  ;;  %v3017_v22 = vld [vmem:[%s3322_s5 + $0x10] sm:$0xff]  }
  0xfc   :  { %1531 = vmatpush1.bf16.msra.mxu1 %v2868_v19 }
  0xfd   :  { %1532 = vmatprep.subr.bf16.mxu1 %v2873_v20  ;;  %2039 = vmatpush1.bf16.msra.mxu0 %v2952_v25  ;;  %v3018_v25 = vld [vmem:[%s3322_s5 + $0x58] sm:$0xff]  }
  0xfe   :  { %2040 = vmatprep.subr.bf16.mxu0 %v2957_v26 }
 0x100   :  { %1533 = vmatpush1.bf16.msra.mxu1 %v2871_v23 }
 0x101   :  { %1534 = vmatprep.subr.bf16.mxu1 %v2876_v24  ;;  %2041 = vmatpush1.bf16.msra.mxu0 %v2955_v35  ;;  %v2969_v24 = vld [vmem:[#allocation6 + $0x114] ss:$8 sps:$4 sm:$0xff]  }
 0x102   :  { %2042 = vmatprep.subr.bf16.mxu0 %v2960_v37  ;;  %v2978_v37 = vld [vmem:[#allocation6 + $0x144] ss:$8 sps:$4 sm:$0xff]  }
 0x104   :  { %1535 = vmatpush1.bf16.msra.mxu1 %v2874_v11 }
 0x105   :  { %1536 = vmatprep.subr.bf16.mxu1 %v2879_v8  ;;  %2043 = vmatpush1.bf16.msra.mxu0 %v2958_v38  ;;  %v2967_v8 = vld [vmem:[#allocation6 + $0x110] ss:$8 sps:$4 sm:$0xff]   ;;  %v2976_v38 = vld [vmem:[#allocation6 + $0x140] ss:$8 sps:$4 sm:$0xff]  }
 0x106   :  { %2044 = vmatprep.subr.bf16.mxu0 %v2963_v41  ;;  %v2984_v41 = vld [vmem:[#allocation6 + $0x164] ss:$8 sps:$4 sm:$0xff]  }
 0x108   :  { %1537 = vmatpush1.bf16.msra.mxu1 %v2877_v27  ;;  %v3019_v27 = vld [vmem:[%s3322_s5 + $0x18] sm:$0xff]  }
 0x109   :  { %1538 = vmatprep.subr.bf16.mxu1 %v2882_v28  ;;  %2045 = vmatpush1.bf16.msra.mxu0 %v2961_v42  ;;  %v2972_v28 = vld [vmem:[#allocation6 + $0x124] ss:$8 sps:$4 sm:$0xff]   ;;  %v2982_v42 = vld [vmem:[#allocation6 + $0x160] ss:$8 sps:$4 sm:$0xff]  }
 0x10a   :  { %2055 = vmatprep.subr.bf16.mxu0 %v2966_v45  ;;  %v2990_v45 = vld [vmem:[#allocation6 + $0x184] ss:$8 sps:$4 sm:$0xff]  }
 0x10c   :  { %1539 = vmatpush1.bf16.msra.mxu1 %v2880_v29 }
 0x10d   :  { %1540 = vmatprep.subr.bf16.mxu1 %v2885_v30  ;;  %v3020_v30 = vld [vmem:[%s3322_s5 + $0x60] sm:$0xff]  }
 0x110   :  { %1541 = vmatpush1.bf16.msra.mxu1 %v2883_v31  ;;  %v2970_v31 = vld [vmem:[#allocation6 + $0x120] ss:$8 sps:$4 sm:$0xff]  }
 0x111   :  { %1542 = vmatprep.subr.bf16.mxu1 %v2888_v32  ;;  %v3021_v32 = vld [vmem:[%s3322_s5 + $0x20] sm:$0xff]  }
 0x114   :  { %1543 = vmatpush1.bf16.msra.mxu1 %v2886_v52  ;;  %v2975_v52 = vld [vmem:[#allocation6 + $0x134] ss:$8 sps:$4 sm:$0xff]  }
 0x115   :  { %1544 = vmatprep.subr.bf16.mxu1 %v2891_v33  ;;  %v3022_v33 = vld [vmem:[%s3322_s5 + $0x68] sm:$0xff]  }
 0x118   :  { %1545 = vmatpush1.bf16.msra.mxu1 %v2889_v34  ;;  %v2973_v34 = vld [vmem:[#allocation6 + $0x130] ss:$8 sps:$4 sm:$0xff]  }
 0x119   :  { %1546 = vmatprep.subr.bf16.mxu1 %v2894_v36  ;;  %v3023_v36 = vld [vmem:[%s3322_s5 + $0x28] sm:$0xff]  }
 0x11c   :  { %1547 = vmatpush1.bf16.msra.mxu1 %v2892_v39  ;;  %v2981_v39 = vld [vmem:[#allocation6 + $0x154] ss:$8 sps:$4 sm:$0xff]  }
 0x11d   :  { %1548 = vmatprep.subr.bf16.mxu1 %v2897_v40  ;;  %v2979_v40 = vld [vmem:[#allocation6 + $0x150] ss:$8 sps:$4 sm:$0xff]  }
 0x120   :  { %1549 = vmatpush1.bf16.msra.mxu1 %v2895_v43  ;;  %v2987_v43 = vld [vmem:[#allocation6 + $0x174] ss:$8 sps:$4 sm:$0xff]  }
 0x121   :  { %1550 = vmatprep.subr.bf16.mxu1 %v2900_v44  ;;  %v2985_v44 = vld [vmem:[#allocation6 + $0x170] ss:$8 sps:$4 sm:$0xff]  }
 0x124   :  { %1551 = vmatpush1.bf16.msra.mxu1 %v2898_v46  ;;  %v2988_v46 = vld [vmem:[#allocation6 + $0x180] ss:$8 sps:$4 sm:$0xff]  }
 0x125   :  { %1552 = vmatprep.subr.bf16.mxu1 %v2903_v47  ;;  %v2993_v47 = vld [vmem:[#allocation6 + $0x194] ss:$8 sps:$4 sm:$0xff]  }
 0x128   :  { %1553 = vmatpush1.bf16.msra.mxu1 %v2901_v48  ;;  %v2991_v48 = vld [vmem:[#allocation6 + $0x190] ss:$8 sps:$4 sm:$0xff]  }
 0x129   :  { %1554 = vmatprep.subr.bf16.mxu1 %v2906_v49  ;;  %v2996_v49 = vld [vmem:[#allocation6 + $0x1a4] ss:$8 sps:$4 sm:$0xff]  }
 0x12c   :  { %1555 = vmatpush1.bf16.msra.mxu1 %v2904_v50  ;;  %v2994_v50 = vld [vmem:[#allocation6 + $0x1a0] ss:$8 sps:$4 sm:$0xff]  }
 0x12d   :  { %1556 = vmatprep.subr.bf16.mxu1 %v2909_v51  ;;  %v2999_v51 = vld [vmem:[#allocation6 + $0x1b4] ss:$8 sps:$4 sm:$0xff]  }
 0x130   :  { %1557 = vmatpush1.bf16.msra.mxu1 %v2907_v53  ;;  %v2997_v53 = vld [vmem:[#allocation6 + $0x1b0] ss:$8 sps:$4 sm:$0xff]  }
 0x131   :  { %1558 = vmatprep.subr.bf16.mxu1 %v2915_v54  ;;  %v3002_v54 = vld [vmem:[#allocation6 + $0x1c4] ss:$8 sps:$4 sm:$0xff]  }
 0x134   :  { %1559 = vmatpush1.bf16.msra.mxu1 %v2913_v55  ;;  %v3000_v55 = vld [vmem:[#allocation6 + $0x1c0] ss:$8 sps:$4 sm:$0xff]  }
 0x135   :  { %2562 = vmatprep.subr.bf16.mxu1 %v3012_v3 }
 0x137   :  { %1561 = vmatmul.mubr.bf16.vlgmr.msra.gmra.mrb[4].mxu1 %v3223_v16  ;;  %v285_v16 = vrot.slane %v3237_v63, %v284_v0 }
 0x138   :  { %2563 = vmatpush3.bf16.msra.mxu1 %v3013_v4 }
 0x139   :  { %2564 = vmatprep.subr.bf16.mxu1 %v3014_v5 }
 0x13c   :  { %2565 = vmatpush3.bf16.msra.mxu1 %v3015_v14 }
 0x13d   :  { %2566 = vmatprep.subr.bf16.mxu1 %v3016_v18 }
 0x140   :  { %2567 = vmatpush3.bf16.msra.mxu1 %v3017_v22  ;;  %v3027_v22 = vld [vmem:[%s3322_s5 + $0x38] sm:$0xff]  }
 0x141   :  { %2568 = vmatprep.subr.bf16.mxu1 %v3018_v25 }
 0x144   :  { %2569 = vmatpush3.bf16.msra.mxu1 %v3019_v27 }
 0x145   :  { %2570 = vmatprep.subr.bf16.mxu1 %v3020_v30 }
 0x148   :  { %2571 = vmatpush3.bf16.msra.mxu1 %v3021_v32 }
 0x149   :  { %2572 = vmatprep.subr.bf16.mxu1 %v3022_v33 }
 0x14a   :  { %v1316_v56 = vpop.f32.mrb[0].mxu1 }
 0x14b   :  { %v1318_v57 = vpop.f32.mrb[1].mxu1  ;;  %v1317_v2 = vadd.f32 %v1316_v56, %v281_v1  ;;  %v3005_v56 = vld [vmem:[#allocation6 + $0x1d4] ss:$8 sps:$4 sm:$0xff]   ;;  %v3009_v1 = vld [vmem:[#allocation6 + $0x1f0] ss:$8 sps:$4 sm:$0xff]  }
 0x14c   :  { %v1320_v58 = vpop.f32.mrb[2].mxu1  ;;  %v1319_v6 = vadd.f32 %v1318_v57, %v285_v16  ;;  %2573 = vmatpush3.bf16.msra.mxu1 %v3023_v36  ;;  %v3003_v57 = vld [vmem:[#allocation6 + $0x1d0] ss:$8 sps:$4 sm:$0xff]   ;;  %v288_v16 = vsub.s32 2, %v3234_v61 }
 0x14d   :  { %v1321_v59 = vpop.f32.mrb[3].mxu1  ;;  %v3008_v58 = vld [vmem:[#allocation6 + $0x1e4] ss:$8 sps:$4 sm:$0xff]  }
 0x14e   :  { %v3006_v59 = vld [vmem:[#allocation6 + $0x1e0] ss:$8 sps:$4 sm:$0xff]   ;;  %v289_v3 = vrot.slane %v3237_v63, %v288_v16 }
 0x197   :  { %v1439_v7 = vpop.f32.mrb[0].mxu0 }
 0x198   :  { %v2585_v9 = vadd.f32 %v1439_v7, %v1317_v2  ;;  %v1441_v10 = vpop.f32.mrb[1].mxu0  ;;  %v292_v2 = vsub.s32 3, %v3234_v61 }
 0x199   :  { %v2587_v12 = vadd.f32 %v1441_v10, %v1319_v6  ;;  %v1443_v13 = vpop.f32.mrb[2].mxu0 }
 0x19a   :  { %v1610_v15 = vmax.f32 %v2585_v9, 0.0  ;;  %v1444_v17 = vpop.f32.mrb[3].mxu0  ;;  %v293_v4 = vrot.slane %v3237_v63, %v292_v2  ;;  %v3024_v63 = vld [vmem:[%s3322_s5 + $0x70] sm:$0xff]  }
 0x19b   :  { %v1611_v19 = vmax.f32 %v2587_v12, 0.0  ;;  %2574 = vmatprep.subr.bf16.mxu1 %v3024_v63 }
 0x19c   :  { %v1614_v23 = vpack.c.bf16 %v1610_v15, %v1610_v15 }
 0x19d   :  { %v1615_v20 = vpack.c.bf16 %v1611_v19, %v1611_v19 }
 0x19f   :  { %2046 = vmatprep.mubr.bf16.mxu0 %v1615_v20  ;;  %v3267_v26 = vpop.f32.mrb[4].mxu0  ;;  %v3025_v20 = vld [vmem:[%s3322_s5 + $0x30] sm:$0xff]  }
 0x1a0   :  { %2047 = vmatmul.mubr.bf16.vlgmr.msra.gmra.mrb[8].mxu0 %v1614_v23  ;;  %v3269_v11 = vpop.f32.mrb[5].mxu0  ;;  %2575 = vmatpush3.bf16.msra.mxu1 %v3025_v20  ;;  %v1682_v23 = vld [vmem:[%s3321_s4] sm:$0x3] }
 0x1a1   :  { %2056 = vmatpush1.bf16.msra.mxu0 %v2964_v21  ;;  %v1607_v35 = vpop.f32.mrb[6].mxu0  ;;  %v3026_v21 = vld [vmem:[%s3322_s5 + $0x78] sm:$0xff]   ;;  %v1691_v25 = vrot.slane %v1682_v23, %v284_v0 }
 0x1a2   :  { %2057 = vmatprep.subr.bf16.mxu0 %v2969_v24  ;;  %v1608_v29 = vpop.f32.mrb[7].mxu0  ;;  %2576 = vmatprep.subr.bf16.mxu1 %v3026_v21  ;;  %v1687_v24 = vrot.slane %v1682_v23, %v280_v62  ;;  %v2545_v62 = vld [vmem:[%s3323_s6] ss:$0 sm:$0xff] }
 0x1a4   :  { %2577 = vmatpush3.bf16.msra.mxu1 %v3027_v22 }
 0x1a5   :  { %2058 = vmatpush1.bf16.msra.mxu0 %v2967_v8 }
 0x1a6   :  { %2059 = vmatprep.subr.bf16.mxu0 %v2972_v28 }
 0x1a9   :  { %2060 = vmatpush1.bf16.msra.mxu0 %v2970_v31 }
 0x1aa   :  { %2061 = vmatprep.subr.bf16.mxu0 %v2975_v52 }
 0x1ad   :  { %2062 = vmatpush1.bf16.msra.mxu0 %v2973_v34 }
 0x1ae   :  { %2063 = vmatprep.subr.bf16.mxu0 %v2978_v37 }
 0x1b1   :  { %2064 = vmatpush1.bf16.msra.mxu0 %v2976_v38 }
 0x1b2   :  { %2065 = vmatprep.subr.bf16.mxu0 %v2981_v39 }
 0x1b5   :  { %2066 = vmatpush1.bf16.msra.mxu0 %v2979_v40 }
 0x1b6   :  { %2067 = vmatprep.subr.bf16.mxu0 %v2984_v41 }
 0x1b9   :  { %2068 = vmatpush1.bf16.msra.mxu0 %v2982_v42 }
 0x1ba   :  { %2069 = vmatprep.subr.bf16.mxu0 %v2987_v43 }
 0x1bd   :  { %2070 = vmatpush1.bf16.msra.mxu0 %v2985_v44 }
 0x1be   :  { %2071 = vmatprep.subr.bf16.mxu0 %v2990_v45 }
 0x1c1   :  { %2072 = vmatpush1.bf16.msra.mxu0 %v2988_v46 }
 0x1c2   :  { %2073 = vmatprep.subr.bf16.mxu0 %v2993_v47 }
 0x1c5   :  { %2074 = vmatpush1.bf16.msra.mxu0 %v2991_v48 }
 0x1c6   :  { %2075 = vmatprep.subr.bf16.mxu0 %v2996_v49 }
 0x1c9   :  { %2076 = vmatpush1.bf16.msra.mxu0 %v2994_v50 }
 0x1ca   :  { %2077 = vmatprep.subr.bf16.mxu0 %v2999_v51 }
 0x1cd   :  { %2078 = vmatpush1.bf16.msra.mxu0 %v2997_v53 }
 0x1ce   :  { %2079 = vmatprep.subr.bf16.mxu0 %v3002_v54 }
 0x1d1   :  { %2080 = vmatpush1.bf16.msra.mxu0 %v3000_v55 }
 0x1d2   :  { %2081 = vmatprep.subr.bf16.mxu0 %v3005_v56 }
 0x1d5   :  { %2082 = vmatpush1.bf16.msra.mxu0 %v3003_v57 }
 0x1d6   :  { %2083 = vmatprep.subr.bf16.mxu0 %v3008_v58 }
 0x1d9   :  { %2084 = vmatpush1.bf16.msra.mxu0 %v3006_v59 }
 0x1da   :  { %2085 = vmatprep.subr.bf16.mxu0 %v3011_v60 }
 0x1dd   :  { %2086 = vmatpush1.bf16.msra.mxu0 %v3009_v1 }
 0x20a   :  { %v1562_v5 = vpop.f32.mrb[4].mxu1 }
 0x20b   :  { %v2588_v6 = vadd.f32 %v1562_v5, %v289_v3  ;;  %v1564_v7 = vpop.f32.mrb[5].mxu1 }
 0x20c   :  { %v2590_v9 = vadd.f32 %v1564_v7, %v293_v4  ;;  %v1566_v10 = vpop.f32.mrb[6].mxu1 }
 0x20d   :  { %v2589_v12 = vadd.f32 %v2588_v6, %v3267_v26  ;;  %v1567_v13 = vpop.f32.mrb[7].mxu1 }
 0x20e   :  { %v2591_v14 = vadd.f32 %v2590_v9, %v3269_v11 }
 0x20f   :  { %v1612_v15 = vmax.f32 %v2589_v12, 0.0 }
 0x210   :  { %v1613_v17 = vmax.f32 %v2591_v14, 0.0 }
 0x211   :  { %v1616_v19 = vpack.c.bf16 %v1612_v15, %v1612_v15 }
 0x212   :  { %v1617_v18 = vpack.c.bf16 %v1613_v17, %v1613_v17 }
 0x214   :  { %2087 = vmatprep.mubr.bf16.mxu0 %v1617_v18 }
 0x215   :  { %2088 = vmatmul.mubr.bf16.vlgmr.msra.gmra.mrb[8].mxu0 %v1616_v19 }
 0x2e8   :  { %v2089_v26 = vpop.f32.mrb[8].mxu0 }
 0x2e9   :  { %v2592_v11 = vadd.f32 %v2089_v26, %v1687_v24  ;;  %v2091_v8 = vpop.f32.mrb[9].mxu0 }
 0x2ea   :  { %v2593_v35 = vadd.f32 %v2091_v8, %v1691_v25  ;;  %v2093_v27 = vpop.f32.mrb[10].mxu0 }
 0x2eb   :  { %v2096_v28 = vmax.f32 %v2592_v11, 0.0  ;;  %v2094_v29 = vpop.f32.mrb[11].mxu0 }
 0x2ec   :  { %v2097_v30 = vmax.f32 %v2593_v35, 0.0 }
 0x2ed   :  { %v2098_v32 = vpack.c.bf16 %v2096_v28, %v2096_v28 }
 0x2ee   :  { %v2099_v31 = vpack.c.bf16 %v2097_v30, %v2097_v30 }
 0x2f0   :  { %2267 = vmatprep.mubr.bf16.mxu1 %v2099_v31 }
 0x2f1   :  { %2268 = vmatmul.mubr.bf16.vlgmr.msra.gmra.mrb[8].mxu1 %v2098_v32 }
 0x3c4   :  { %v2578_v52 = vpop.f32.mrb[8].mxu1 }
 0x3c5   :  { %v2579_v33 = vpop.f32.mrb[9].mxu1 }
 0x3c6   :  { %v2580_v61 = vadd.f32 %v2579_v33, %v2578_v52  ;;  %v2581_v0 = vpop.f32.mrb[10].mxu1 }
 0x3c7   :  { %v2582_v34 = vpop.f32.mrb[11].mxu1 }
 0x3c8   :  { %v2270_v36 = vadd.f32 %v2580_v61, %v2545_v62 }
 0x3ca   :  { %v2275_v37 = vpack.c.bf16 %v2270_v36, %v2270_v36 }
 0x3cc   :  { %2276 = vst [vmem:[%s3324_s7] sm:$0xf] %v2275_v37 }
 0x3cd   :  { %2281 = vsyncpa [#allocation3], 1 }
 0x3ce   :  { %2282 = vsyncpa [#allocation5], 1 }

</bundles_post_ra>
